<compile_context>
chip_gen: v5e
topology: v5e:2x2
jax: 0.10.0
libtpu: 0.0.40
codegen_flags: <defaults>
</compile_context>

<pallas_src>
import jax
import jax.numpy as jnp
from jax.experimental import pallas as pl
from jax.experimental.pallas import tpu as pltpu


def _round_up(x, m):
    return ((x + m - 1) // m) * m


def mlp_kernel(xT_ref, w1_ref, b1_ref, w2_ref, b2_ref, o_ref):
    """One batch tile, batch-on-lanes layout.

    xT_ref : (D, TB)  one example per lane-column
    w1_ref : (H, D)   torch layer1.weight (out, in), used as-is
    b1_ref : (H, 1)
    w2_ref : (O, H)   torch layer2.weight (out, in), used as-is
    b2_ref : (O, 1)
    o_ref  : (O, TB)  lane-dense output slab
    """
    # Layer 1 on the MXU: (H, D) @ (D, TB) -> (H, TB); f32 accumulation even
    # when xT / W1 are stored bf16.
    h = jnp.dot(w1_ref[...], xT_ref[...], preferred_element_type=jnp.float32)
    h = jnp.maximum(h + b1_ref[...], 0.0)          # (H,1) bias broadcasts over lanes; ReLU on VPU

    # Layer 2: (O, H) @ (H, TB) -> (O, TB); stays lane-dense, no masked epilogue.
    y = jnp.dot(w2_ref[...], h, preferred_element_type=jnp.float32)
    o_ref[...] = (y + b2_ref[...]).astype(o_ref.dtype)


def c3cnn_forward_xt(xT, w1, b1, w2, b2, *, tile_batch=8192, core_parallel=False):
    """Batch-on-lanes forward.

    xT : (D, B)  input, one example per column (dense lane layout in HBM)
    w1 : (H, D)  torch layer1.weight
    b1 : (H,)    torch layer1.bias
    w2 : (O, H)  torch layer2.weight
    b2 : (O,)    torch layer2.bias
    returns (O, B) float32 lane-dense slab.

    core_parallel=True: use CORE_PARALLEL on the batch grid axis to shard tiles
    across both TensorCores on multi-TC parts (v7x).
    """
    D, B = xT.shape
    H = w1.shape[0]
    O = w2.shape[0]

    # Batch tile: multiple of 128 so every block is lane-dense; tile_batch is a
    # cap — we take the largest 128-aligned tile that covers B, up to the cap,
    # so small/ragged batches become a single (partial) block and large batches
    # amortize the per-grid-step overhead over ~8K examples.
    TB = min(_round_up(tile_batch, 128), _round_up(B, 128))
    grid = (pl.cdiv(B, TB),)   # partial final block: OOB reads discarded, OOB writes masked

    # Layer-1 operands share x's (possibly bf16) storage dtype; tiny layer-2
    # params stay f32.  NOTE: bf16 storage of x/W1 is a documented precision
    # tradeoff — accumulation is still f32 but inputs are rounded to bf16.
    w1 = w1.astype(xT.dtype)
    b1 = b1.reshape(H, 1).astype(jnp.float32)
    w2 = w2.astype(jnp.float32)
    b2 = b2.reshape(O, 1).astype(jnp.float32)

    itemsize = jnp.dtype(xT.dtype).itemsize
    cost = pl.CostEstimate(
        flops=2 * B * H * (D + O),
        transcendentals=0,
        bytes_accessed=(B * D * itemsize          # xT read (dense)
                        + B * O * 4               # y write
                        + D * H * itemsize        # W1
                        + (H + O * H + O) * 4),   # b1, W2, b2
    )

    batch_axis_semantics = pltpu.CORE_PARALLEL if core_parallel else "parallel"

    out = pl.pallas_call(
        mlp_kernel,
        out_shape=jax.ShapeDtypeStruct((O, B), jnp.float32),
        grid=grid,
        in_specs=[
            pl.BlockSpec((D, TB), lambda i: (0, i)),   # xT: tiled over batch (lane axis)
            pl.BlockSpec((H, D), lambda i: (0, 0)),    # W1: resident in VMEM
            pl.BlockSpec((H, 1), lambda i: (0, 0)),    # b1: resident in VMEM
            pl.BlockSpec((O, H), lambda i: (0, 0)),    # W2: resident in VMEM
            pl.BlockSpec((O, 1), lambda i: (0, 0)),    # b2: resident in VMEM
        ],
        out_specs=pl.BlockSpec((O, TB), lambda i: (0, i)),   # lane-dense output slab
        compiler_params=pltpu.CompilerParams(
            dimension_semantics=(batch_axis_semantics,),
            # Explicit, generous scoped-VMEM limit that fits every generation;
            # actual footprint is ~2 x D x TB x itemsize (~1 MiB at TB=8192 f32).
            vmem_limit_bytes=32 * 1024 * 1024,
        ),
        cost_estimate=cost,
    )(xT, w1, b1, w2, b2)
    return out


def c3cnn_forward(x, w1, b1, w2, b2, *, tile_batch=8192, core_parallel=False):
    """Torch-compatible wrapper: x (B, D) -> (B, 1) (general (B, O)).

    Weights/biases are in torch's native layouts:
      w1 (8, input_size), b1 (8,), w2 (1, 8), b2 (1,).
    """
    # TODO(synk): for peak bandwidth produce x already transposed (D, B) upstream
    # and call c3cnn_forward_xt directly; the x.T here is one extra XLA pass over x.
    out = c3cnn_forward_xt(x.T, w1, b1, w2, b2,
                           tile_batch=tile_batch, core_parallel=core_parallel)
    return out.T   # (B, O); for O=1 this is a trivial reshape of the (1, B) slab


def init_params(key, input_size, hidden=8, out=1):
    """Deterministic init mimicking torch.nn.Linear default U[-1/sqrt(fan_in), 1/sqrt(fan_in)].

    Returns weights in torch's native (out, in) layout."""
    k1, k2, k3, k4 = jax.random.split(key, 4)
    bound1 = 1.0 / jnp.sqrt(jnp.float32(input_size))
    bound2 = 1.0 / jnp.sqrt(jnp.float32(hidden))
    w1 = jax.random.uniform(k1, (hidden, input_size), jnp.float32, -bound1, bound1)
    b1 = jax.random.uniform(k2, (hidden,), jnp.float32, -bound1, bound1)
    w2 = jax.random.uniform(k3, (out, hidden), jnp.float32, -bound2, bound2)
    b2 = jax.random.uniform(k4, (out,), jnp.float32, -bound2, bound2)
    return w1, b1, w2, b2


if __name__ == "__main__":
    key = jax.random.PRNGKey(0)
    k_x, k_p = jax.random.split(key)

    batch = 300          # deliberately ragged: exercises the partial final block
    input_size = 16
    hidden, out_dim = 8, 1

    x = jax.random.normal(k_x, (batch, input_size), jnp.float32)
    w1, b1, w2, b2 = init_params(k_p, input_size, hidden, out_dim)

    # Pure-JAX reference with exact torch semantics.
    ref = jnp.maximum(x @ w1.T + b1[None, :], 0.0) @ w2.T + b2[None, :]

    # --- f32 path, single big tile (default cap) ---------------------------
    y = jax.block_until_ready(c3cnn_forward(x, w1, b1, w2, b2))
    assert y.shape == (batch, 1)
    assert jnp.allclose(y, ref, atol=1e-3, rtol=1e-3)

    # --- f32 path, multi-tile grid with a partial final block --------------
    y2 = jax.block_until_ready(c3cnn_forward(x, w1, b1, w2, b2, tile_batch=128))
    assert y2.shape == (batch, 1)
    assert jnp.allclose(y2, ref, atol=1e-3, rtol=1e-3)

    # --- bf16-storage path: halves the dominant HBM read; f32 accumulate.
    #     (Precision tradeoff vs. the f32 torch reference — not bit-exact.)
    xb = x.astype(jnp.bfloat16)
    yb = jax.block_until_ready(c3cnn_forward(xb, w1, b1, w2, b2))
    refb = (jnp.maximum(
        xb.astype(jnp.float32) @ w1.astype(jnp.bfloat16).astype(jnp.float32).T
        + b1[None, :], 0.0) @ w2.T + b2[None, :])
    assert yb.shape == (batch, 1)
    assert jnp.allclose(yb, refb, atol=2e-2, rtol=2e-2)

    print("KERNEL_OK")
</pallas_src>

<mosaic_0001>
module attributes {stable_mosaic.version = 11 : i64} {
  func.func @mlp_kernel(%arg0: i32, %arg1: memref<16x384xf32, #tpu.memory_space<vmem>>, %arg2: memref<8x16xf32, #tpu.memory_space<vmem>>, %arg3: memref<8x1xf32, #tpu.memory_space<vmem>>, %arg4: memref<1x8xf32, #tpu.memory_space<vmem>>, %arg5: memref<1x1xf32, #tpu.memory_space<vmem>>, %arg6: memref<1x384xf32, #tpu.memory_space<vmem>>) attributes {dimension_semantics = [#tpu.dimension_semantics<parallel>], iteration_bounds = array<i64: 1>, scalar_prefetch = 0 : i64, scratch_operands = 0 : i64, tpu.core_type = #tpu.core_type<tc>, window_params = [{transform_indices = @transform_0, window_bounds = array<i64: 16, 384>}, {pipeline_mode = #tpu.pipeline_mode<synchronous>, transform_indices = @transform_1, window_bounds = array<i64: 8, 16>}, {pipeline_mode = #tpu.pipeline_mode<synchronous>, transform_indices = @transform_2, window_bounds = array<i64: 8, 1>}, {pipeline_mode = #tpu.pipeline_mode<synchronous>, transform_indices = @transform_3, window_bounds = array<i64: 1, 8>}, {pipeline_mode = #tpu.pipeline_mode<synchronous>, transform_indices = @transform_4, window_bounds = array<i64: 1, 1>}, {transform_indices = @transform_5, window_bounds = array<i64: 1, 384>}]} {
    %c0 = arith.constant 0 : index
    %c0_0 = arith.constant 0 : index
    %0 = vector.load %arg2[%c0, %c0_0] : memref<8x16xf32, #tpu.memory_space<vmem>>, vector<8x16xf32>
    %c0_1 = arith.constant 0 : index
    %c0_2 = arith.constant 0 : index
    %1 = vector.load %arg1[%c0_1, %c0_2] : memref<16x384xf32, #tpu.memory_space<vmem>>, vector<16x384xf32>
    %cst = arith.constant dense<0.000000e+00> : vector<8x384xf32>
    %2 = tpu.matmul %0, %1, %cst {dimension_numbers = #tpu.dot_dimension_numbers<[1], [0], [0], [1], [0, 0, 1, 1], [], []>} : vector<8x16xf32>, vector<16x384xf32>, vector<8x384xf32> -> vector<8x384xf32>
    %c0_3 = arith.constant 0 : index
    %c0_4 = arith.constant 0 : index
    %3 = vector.load %arg3[%c0_3, %c0_4] : memref<8x1xf32, #tpu.memory_space<vmem>>, vector<8x1xf32>
    %4 = vector.broadcast %3 : vector<8x1xf32> to vector<8x384xf32>
    %5 = arith.addf %2, %4 : vector<8x384xf32>
    %cst_5 = arith.constant 0.000000e+00 : f32
    %6 = vector.broadcast %cst_5 : f32 to vector<8x384xf32>
    %7 = arith.maximumf %5, %6 : vector<8x384xf32>
    %c0_6 = arith.constant 0 : index
    %c0_7 = arith.constant 0 : index
    %8 = vector.load %arg4[%c0_6, %c0_7] : memref<1x8xf32, #tpu.memory_space<vmem>>, vector<1x8xf32>
    %cst_8 = arith.constant dense<0.000000e+00> : vector<1x384xf32>
    %9 = tpu.matmul %8, %7, %cst_8 {dimension_numbers = #tpu.dot_dimension_numbers<[1], [0], [0], [1], [0, 0, 1, 1], [], []>} : vector<1x8xf32>, vector<8x384xf32>, vector<1x384xf32> -> vector<1x384xf32>
    %c0_9 = arith.constant 0 : index
    %c0_10 = arith.constant 0 : index
    %10 = vector.load %arg5[%c0_9, %c0_10] : memref<1x1xf32, #tpu.memory_space<vmem>>, vector<1x1xf32>
    %11 = vector.broadcast %10 : vector<1x1xf32> to vector<1x384xf32>
    %12 = arith.addf %9, %11 : vector<1x384xf32>
    %c0_11 = arith.constant 0 : index
    %c0_12 = arith.constant 0 : index
    %13 = vector.load %arg6[%c0_11, %c0_12] : memref<1x384xf32, #tpu.memory_space<vmem>>, vector<1x384xf32>
    tpu.vector_store %arg6[%c0_11, %c0_12], %12 {strides = array<i32>} : memref<1x384xf32, #tpu.memory_space<vmem>>, vector<1x384xf32>,
    return
  }
  func.func @transform_0(%arg0: i32) -> (i32, i32) {
    %c0_i32 = arith.constant 0 : i32
    %c0_i32_0 = arith.constant 0 : i32
    return %c0_i32, %arg0 : i32, i32
  }
  func.func @transform_1(%arg0: i32) -> (i32, i32) {
    %c0_i32 = arith.constant 0 : i32
    %c0_i32_0 = arith.constant 0 : i32
    %c0_i32_1 = arith.constant 0 : i32
    return %c0_i32, %c0_i32_0 : i32, i32
  }
  func.func @transform_2(%arg0: i32) -> (i32, i32) {
    %c0_i32 = arith.constant 0 : i32
    %c0_i32_0 = arith.constant 0 : i32
    %c0_i32_1 = arith.constant 0 : i32
    return %c0_i32, %c0_i32_0 : i32, i32
  }
  func.func @transform_3(%arg0: i32) -> (i32, i32) {
    %c0_i32 = arith.constant 0 : i32
    %c0_i32_0 = arith.constant 0 : i32
    %c0_i32_1 = arith.constant 0 : i32
    return %c0_i32, %c0_i32_0 : i32, i32
  }
  func.func @transform_4(%arg0: i32) -> (i32, i32) {
    %c0_i32 = arith.constant 0 : i32
    %c0_i32_0 = arith.constant 0 : i32
    %c0_i32_1 = arith.constant 0 : i32
    return %c0_i32, %c0_i32_0 : i32, i32
  }
  func.func @transform_5(%arg0: i32) -> (i32, i32) {
    %c0_i32 = arith.constant 0 : i32
    %c0_i32_0 = arith.constant 0 : i32
    return %c0_i32, %arg0 : i32, i32
  }
}

</mosaic_0001>

<bundles_post_ra>
// kernel: tpu_custom_call.1
= control target key start
LH: loop header
LB: loop body
LE: loop exit
PB: predicated region body
PF: predicated region fallthrough
CT: control target
= control target key end

     0   :  { %s340_s0 = inlined_call_operand.hbm [shape: f32[16,300], index: 0, kind: input, shape index: {}]   ;;  %s341_s1 = inlined_call_operand.vmem [shape: f32[8,16], index: 1, kind: input, shape index: {}]   ;;  %s342_s2 = inlined_call_operand.vmem [shape: f32[8,1], index: 2, kind: input, shape index: {}]   ;;  %s343_s3 = inlined_call_operand.vmem [shape: f32[1,8], index: 3, kind: input, shape index: {}]   ;;  %s344_s4 = inlined_call_operand.<no memory space> [shape: f32[1,1], index: 4, kind: input, shape index: {}]   ;;  %s345_s5 = inlined_call_operand.hbm [shape: f32[1,300], index: 5, kind: output, shape index: {}]  }
   0x1   :  { %v10_v0 = vstv %s344_s4 }
   0x2   :  { %11 = vst [vmem:[#allocation2] sm:$0x1] %v10_v0 }
   0x3   :  { %12 = vsyncpa [#allocation4], 0 }
   0x4   :  { %13 = vsyncpa [#allocation5], 0  ;;  %s18_s22 = sshll.u32 %s340_s0, 4  ;;  %s287_s23 = smov [#allocation3]   ;;  %s19_s22 = int_to_ptr.hbm [resolvable:$true] %s18_s22 }
   0x5   :  { %s20_s24 = sshll.u32 %s287_s23, 4  ;;  %s288_s25 = smov 384   ;;  %s21_s24 = int_to_ptr.vmem [resolvable:$true] %s20_s24 }
   0x6   :  { %s289_s26 = smov 24  }
   0x7   :  { %26 = dma.hbm_to_vmem [thread:$0]  %s19_s22, 768, %s21_s24, [#allocation4], %s288_s25, %s288_s25, %s289_s26  }
   0x8   :  { %283 = dma.done.wait [#allocation4], 768  }
   0x9   :  { %284 = vsyncadd [#allocation4], 4294966528  ;;  %v290_v1 = vmov 0   ;;  %v43_v2 = vld [vmem:[#allocation3 + $0x18] sm:$0xff]  ;;  %v44_v3 = vld [vmem:[#allocation3 + $0x20] sm:$0xff]  ;;  %vm52_vm0 = vcmask 130048   ;;  %v201_v28 = vlaneseq }
   0xa   :  { %234 = vset.pattern.permute.xlu0 %v290_v1  ;;  %v45_v4 = vld [vmem:[#allocation3 + $0x28] sm:$0xff]  ;;  %70 = vmatpush.msra.mxu0 %v43_v2  ;;  %v40_v5 = vld [vmem:[#allocation3] sm:$0xff]  ;;  %v42_v7 = vld [vmem:[#allocation3 + $0x10] sm:$0xff]  ;;  %vm127_vm1 = vcmask 64512   ;;  %vm196_vm2 = vcmask 1040384   ;;  %s213_s7 = sshll.u32 %s345_s5, 4  ;;  %s214_s7 = int_to_ptr.hbm [resolvable:$true] %s213_s7 }
   0xb   :  { %90 = vmatpush.msra.mxu1 %v44_v3  ;;  %v41_v6 = vld [vmem:[#allocation3 + $0x8] sm:$0xff]  ;;  %110 = vmatpush.msra.mxu2 %v45_v4  ;;  %v39_v8 = vld [vmem:[%s341_s1] sm:$0xff]  ;;  %vm198_vm3 = vcmask 1041408   ;;  %vm203_vm4 = vcmp.lt.s32.totalorder %v201_v28, 384 }
   0xc   :  { %71 = vmatpush.msra.mxu0 %v40_v5  ;;  %v46_v9 = vld [vmem:[%s342_s2] sm:$0xff]  ;;  %s291_s2 = smov [#allocation6]  }
   0xd   :  { %91 = vmatpush.msra.mxu1 %v41_v6  ;;  %111 = vmatpush.msra.mxu2 %v42_v7  ;;  %v120_v10 = vld [vmem:[#allocation2] sm:$0x1] }
   0xe   :  { %223 = vmatmul.msk.f32.vlgmr.msra.gmra.mxu0 %vm52_vm0, %v39_v8  ;;  %224 = vmatmul.msk.f32.vlgmr.msra.gmra.mxu1 %vm52_vm0, %v39_v8  ;;  %v119_v17 = vld [vmem:[%s343_s3] sm:$0x1]  ;;  %s211_s3 = sshll.u32 %s291_s2, 4  ;;  %s212_s3 = int_to_ptr.vmem [resolvable:$true] %s211_s3 }
   0xf   :  { %225 = vmatmul.msk.f32.vlgmr.msra.gmra.mxu2 %vm52_vm0, %v39_v8  ;;  %49 = vperm.xlu0 %234, %v46_v9  }
  0x17   :  { %123 = vperm.xlu0 %234, %v120_v10  }
  0x81   :  { %v50_v11 = vpop.permute.xlu0 %49 }
  0x89   :  { %v124_v23 = vpop.permute.xlu0 %123 }
  0x8a   :  { %v126_v25 = vperm.slane %v124_v23, 0 }
  0x8b   :  { %v73_v12 = vpop.f32.mrf.mxu0  ;;  %v93_v13 = vpop.f32.mrf.mxu1 }
  0x8c   :  { %v74_v14 = vadd.f32 %v73_v12, %v50_v11  ;;  %v94_v15 = vadd.f32 %v93_v13, %v50_v11 }
  0x8e   :  { %v116_v16 = vmax.f32 %v74_v14, 0.0  ;;  %v117_v18 = vmax.f32 %v94_v15, 0.0 }
  0x90   :  { %146 = vmatpush.msra.mxu3 %v116_v16 }
  0x91   :  { %226 = vmatmul.msk.f32.vlgmr.msra.gmra.mxu3 %vm127_vm1, %v119_v17 }
  0x92   :  { %v113_v19 = vpop.f32.mrf.mxu2  ;;  %166 = vmatpush.msrb.mxu3 %v117_v18 }
  0x93   :  { %v114_v20 = vadd.f32 %v113_v19, %v50_v11 }
  0x95   :  { %v118_v21 = vmax.f32 %v114_v20, 0.0 }
  0x97   :  { %186 = vmatpush.msrb.mxu0 %v118_v21 }
  0x98   :  { %228 = vmatmul.msk.f32.vlgmr.msrb.gmra.mxu0 %vm127_vm1, %v119_v17 }
  0x99   :  { %227 = vmatmul.msk.f32.vlgmr.msrb.gmra.mxu3 %vm127_vm1, %v119_v17 }
 0x114   :  { %v148_v22 = vpop.f32.mrf.mxu3 }
 0x115   :  { %v188_v24 = vpop.f32.mrf.mxu0  ;;  %v149_v30 = vadd.f32 %v148_v22, %v126_v25 }
 0x116   :  { %v189_v26 = vadd.f32 %v188_v24, %v126_v25 }
 0x118   :  { %v195_v32 = vrot.slane %v189_v26, 6 }
 0x11c   :  { %v168_v27 = vpop.f32.mrf.mxu3 }
 0x11d   :  { %v169_v29 = vadd.f32 %v168_v27, %v126_v25 }
 0x11f   :  { %v194_v31 = vrot.slane %v169_v29, 7 }
 0x121   :  { %v197_v33 = vsel %vm196_vm2, %v149_v30, %v194_v31 }
 0x122   :  { %v199_v34 = vsel %vm198_vm3, %v197_v33, %v195_v32 }
 0x123   :  { %205 = vst.msk [vmem:[#allocation6] sm:$0x7] %vm203_vm4, %v199_v34 }
 0x124   :  { %216 = dma.vmem_to_hbm [thread:$0]  %s212_s3, 48, %s214_s7, [#allocation5]  }
 0x125   :  { %285 = dma.done.wait [#allocation5], 48  }
 0x126   :  { %286 = vsyncadd [#allocation5], 4294967248 }
 0x127   :  { %221 = vsyncpa [#allocation4], 1 }
 0x128   :  { %222 = vsyncpa [#allocation5], 1 }

</bundles_post_ra>
